<compile_context>
chip_gen: v7x
topology: tpu7x:2x2x1
jax: 0.10.0
libtpu: 0.0.40
codegen_flags: <defaults>
</compile_context>

<pallas_src>
import functools

import jax
import jax.numpy as jnp
from jax.experimental import pallas as pl
from jax.experimental.pallas import tpu as pltpu

LANE = 128   # lane width / uniform padded layer width (all layer dims <= 128)
SUB = 8      # sublane multiple
N_LAYERS = 5


def _round_up(x: int, m: int) -> int:
    return (x + m - 1) // m * m


# ---------------------------------------------------------------------------
# Kernel
# ---------------------------------------------------------------------------
def make_policy_kernel(max_action: float):
    def kernel(x_ref, w_ref, b_ref, mean_ref):
        # x_ref:   (tb, 128)            activations, zero-padded lanes
        # w_ref:   (5*128, 128)         packed weights, layer k = rows [k*128, (k+1)*128)
        # b_ref:   (8, 128)             packed biases, row k = bias of layer k
        # mean_ref:(tb, 128)            lane-dense output block
        h = x_ref[...]
        for k in range(N_LAYERS):                       # static unroll, 5 MXU passes
            w = w_ref[k * LANE:(k + 1) * LANE, :]       # (128, 128) tile-aligned view
            b = b_ref[k:k + 1, :]                       # (1, 128)
            h = jnp.tanh(jnp.dot(h, w, preferred_element_type=jnp.float32) + b)
        # Double tanh matches the reference module exactly (net ends in Tanh,
        # forward applies tanh again before scaling).
        mean_ref[...] = jnp.tanh(h) * max_action

    return kernel


# ---------------------------------------------------------------------------
# Parameter packing (done once, outside the kernel)
# ---------------------------------------------------------------------------
def pack_params(params):
    """Pack 5 Linear layers into one lane-padded weight slab + one bias slab.

    Weights are stored as (in_features, out_features); every layer boundary is
    zero-padded to 128 so padded lanes carry exact zeros through the network.
    """
    w_slab = jnp.zeros((N_LAYERS * LANE, LANE), jnp.float32)
    b_slab = jnp.zeros((SUB, LANE), jnp.float32)
    for k in range(N_LAYERS):
        w = params[f"w{k + 1}"]
        b = params[f"b{k + 1}"].reshape(-1)
        fi, fo = w.shape
        assert fi <= LANE and fo <= LANE, "layer dims must be <= 128 for this packing"
        w_slab = w_slab.at[k * LANE:k * LANE + fi, :fo].set(w)
        b_slab = b_slab.at[k, :fo].set(b)
    return w_slab, b_slab


# ---------------------------------------------------------------------------
# Wrapper
# ---------------------------------------------------------------------------
@functools.partial(jax.jit, static_argnames=("max_action", "block_b"))
def policy_network_forward(x, params, max_action: float = 0.2, block_b: int = 512):
    """x: (B, input_dim) float32. Returns (mean (B, output_dim), std (output_dim,))."""
    B, in_dim = x.shape
    output_dim = params["w5"].shape[1]

    w_slab, b_slab = pack_params(params)

    # Batch tiling: pad B to a multiple of 8 sublanes; grid over batch tiles.
    tb = min(block_b, _round_up(B, SUB))
    B_pad = _round_up(B, tb)
    x_pad = jnp.zeros((B_pad, LANE), jnp.float32).at[:B, :in_dim].set(x)

    mean_pad = pl.pallas_call(
        make_policy_kernel(max_action),
        out_shape=jax.ShapeDtypeStruct((B_pad, LANE), jnp.float32),
        grid_spec=pltpu.PrefetchScalarGridSpec(
            num_scalar_prefetch=0,
            grid=(B_pad // tb,),
            in_specs=[
                pl.BlockSpec((tb, LANE), lambda i: (i, 0)),                 # x tile
                pl.BlockSpec((N_LAYERS * LANE, LANE), lambda i: (0, 0)),    # weight slab (resident)
                pl.BlockSpec((SUB, LANE), lambda i: (0, 0)),                # bias slab (resident)
            ],
            out_specs=pl.BlockSpec((tb, LANE), lambda i: (i, 0)),           # lane-dense mean tile
        ),
        compiler_params=pltpu.CompilerParams(
            dimension_semantics=("parallel",)),
    )(x_pad, w_slab, b_slab)

    mean = mean_pad[:B, :output_dim]
    # std is x-independent: plain JAX, no kernel DMA / masked store.
    std = jnp.exp(params["log_std"]).reshape(-1)
    return mean, std


# ---------------------------------------------------------------------------
# Init + plain-JAX reference
# ---------------------------------------------------------------------------
def init_params(key, input_dim, output_dim, hidden_dim=64):
    """PyTorch-Linear-style init U(-1/sqrt(in), 1/sqrt(in)); weights stored (in, out)."""
    dims = [(input_dim, hidden_dim),
            (hidden_dim, 128),
            (128, 128),
            (128, hidden_dim),
            (hidden_dim, output_dim)]
    params = {}
    keys = jax.random.split(key, 2 * len(dims))
    for i, (fan_in, fan_out) in enumerate(dims):
        bound = 1.0 / (fan_in ** 0.5)
        params[f"w{i + 1}"] = jax.random.uniform(
            keys[2 * i], (fan_in, fan_out), jnp.float32, -bound, bound)
        params[f"b{i + 1}"] = jax.random.uniform(
            keys[2 * i + 1], (fan_out,), jnp.float32, -bound, bound)
    params["log_std"] = jnp.zeros((output_dim,), jnp.float32)   # nn.Parameter(torch.zeros)
    return params


def reference_forward(x, params, max_action=0.2):
    h = jnp.tanh(x @ params["w1"] + params["b1"])
    h = jnp.tanh(h @ params["w2"] + params["b2"])
    h = jnp.tanh(h @ params["w3"] + params["b3"])
    h = jnp.tanh(h @ params["w4"] + params["b4"])
    raw = jnp.tanh(h @ params["w5"] + params["b5"])
    mean = jnp.tanh(raw) * max_action
    std = jnp.exp(params["log_std"]).reshape(-1)
    return mean, std


if __name__ == "__main__":
    key = jax.random.PRNGKey(0)
    kp, kx = jax.random.split(key)

    B = 2
    input_dim = 8
    output_dim = 4
    hidden_dim = 64
    max_action = 0.2

    params = init_params(kp, input_dim, output_dim, hidden_dim)
    x = jax.random.normal(kx, (B, input_dim), jnp.float32)

    mean, std = policy_network_forward(x, params, max_action)
    mean = jax.block_until_ready(mean)
    std = jax.block_until_ready(std)

    ref_mean, ref_std = reference_forward(x, params, max_action)
    assert mean.shape == (B, output_dim)
    assert std.shape == (output_dim,)
    assert jnp.allclose(mean, ref_mean, atol=1e-5, rtol=1e-5)
    assert jnp.allclose(std, ref_std, atol=1e-6, rtol=1e-6)

    print("KERNEL_OK")
</pallas_src>

<mosaic_0001>
module attributes {stable_mosaic.version = 11 : i64} {
  func.func @kernel(%arg0: i32, %arg1: memref<8x128xf32, #tpu.memory_space<vmem>>, %arg2: memref<640x128xf32, #tpu.memory_space<vmem>>, %arg3: memref<8x128xf32, #tpu.memory_space<vmem>>, %arg4: memref<8x128xf32, #tpu.memory_space<vmem>>) attributes {dimension_semantics = [#tpu.dimension_semantics<parallel>], iteration_bounds = array<i64: 1>, scalar_prefetch = 0 : i64, scratch_operands = 0 : i64, tpu.core_type = #tpu.core_type<tc>, window_params = [{transform_indices = @transform_0, window_bounds = array<i64: 8, 128>}, {pipeline_mode = #tpu.pipeline_mode<synchronous>, transform_indices = @transform_1, window_bounds = array<i64: 640, 128>}, {pipeline_mode = #tpu.pipeline_mode<synchronous>, transform_indices = @transform_2, window_bounds = array<i64: 8, 128>}, {transform_indices = @transform_3, window_bounds = array<i64: 8, 128>}]} {
    %c0 = arith.constant 0 : index
    %c0_0 = arith.constant 0 : index
    %0 = vector.load %arg1[%c0, %c0_0] : memref<8x128xf32, #tpu.memory_space<vmem>>, vector<8x128xf32>
    %c0_1 = arith.constant 0 : index
    %c0_2 = arith.constant 0 : index
    %1 = vector.load %arg2[%c0_1, %c0_2] : memref<640x128xf32, #tpu.memory_space<vmem>>, vector<128x128xf32>
    %c0_3 = arith.constant 0 : index
    %c0_4 = arith.constant 0 : index
    %2 = vector.load %arg3[%c0_3, %c0_4] : memref<8x128xf32, #tpu.memory_space<vmem>>, vector<1x128xf32>
    %cst = arith.constant dense<0.000000e+00> : vector<8x128xf32>
    %3 = tpu.matmul %0, %1, %cst {dimension_numbers = #tpu.dot_dimension_numbers<[1], [0], [0], [1], [0, 0, 1, 1], [], []>} : vector<8x128xf32>, vector<128x128xf32>, vector<8x128xf32> -> vector<8x128xf32>
    %4 = vector.broadcast %2 : vector<1x128xf32> to vector<8x128xf32>
    %5 = arith.addf %3, %4 : vector<8x128xf32>
    %6 = math.tanh %5 : vector<8x128xf32>
    %c128 = arith.constant 128 : index
    %c0_5 = arith.constant 0 : index
    %7 = vector.load %arg2[%c128, %c0_5] : memref<640x128xf32, #tpu.memory_space<vmem>>, vector<128x128xf32>
    %c1 = arith.constant 1 : index
    %c0_6 = arith.constant 0 : index
    %8 = vector.load %arg3[%c1, %c0_6] : memref<8x128xf32, #tpu.memory_space<vmem>>, vector<1x128xf32>
    %cst_7 = arith.constant dense<0.000000e+00> : vector<8x128xf32>
    %9 = tpu.matmul %6, %7, %cst_7 {dimension_numbers = #tpu.dot_dimension_numbers<[1], [0], [0], [1], [0, 0, 1, 1], [], []>} : vector<8x128xf32>, vector<128x128xf32>, vector<8x128xf32> -> vector<8x128xf32>
    %10 = vector.broadcast %8 : vector<1x128xf32> to vector<8x128xf32>
    %11 = arith.addf %9, %10 : vector<8x128xf32>
    %12 = math.tanh %11 : vector<8x128xf32>
    %c256 = arith.constant 256 : index
    %c0_8 = arith.constant 0 : index
    %13 = vector.load %arg2[%c256, %c0_8] : memref<640x128xf32, #tpu.memory_space<vmem>>, vector<128x128xf32>
    %c2 = arith.constant 2 : index
    %c0_9 = arith.constant 0 : index
    %14 = vector.load %arg3[%c2, %c0_9] : memref<8x128xf32, #tpu.memory_space<vmem>>, vector<1x128xf32>
    %cst_10 = arith.constant dense<0.000000e+00> : vector<8x128xf32>
    %15 = tpu.matmul %12, %13, %cst_10 {dimension_numbers = #tpu.dot_dimension_numbers<[1], [0], [0], [1], [0, 0, 1, 1], [], []>} : vector<8x128xf32>, vector<128x128xf32>, vector<8x128xf32> -> vector<8x128xf32>
    %16 = vector.broadcast %14 : vector<1x128xf32> to vector<8x128xf32>
    %17 = arith.addf %15, %16 : vector<8x128xf32>
    %18 = math.tanh %17 : vector<8x128xf32>
    %c384 = arith.constant 384 : index
    %c0_11 = arith.constant 0 : index
    %19 = vector.load %arg2[%c384, %c0_11] : memref<640x128xf32, #tpu.memory_space<vmem>>, vector<128x128xf32>
    %c3 = arith.constant 3 : index
    %c0_12 = arith.constant 0 : index
    %20 = vector.load %arg3[%c3, %c0_12] : memref<8x128xf32, #tpu.memory_space<vmem>>, vector<1x128xf32>
    %cst_13 = arith.constant dense<0.000000e+00> : vector<8x128xf32>
    %21 = tpu.matmul %18, %19, %cst_13 {dimension_numbers = #tpu.dot_dimension_numbers<[1], [0], [0], [1], [0, 0, 1, 1], [], []>} : vector<8x128xf32>, vector<128x128xf32>, vector<8x128xf32> -> vector<8x128xf32>
    %22 = vector.broadcast %20 : vector<1x128xf32> to vector<8x128xf32>
    %23 = arith.addf %21, %22 : vector<8x128xf32>
    %24 = math.tanh %23 : vector<8x128xf32>
    %c512 = arith.constant 512 : index
    %c0_14 = arith.constant 0 : index
    %25 = vector.load %arg2[%c512, %c0_14] : memref<640x128xf32, #tpu.memory_space<vmem>>, vector<128x128xf32>
    %c4 = arith.constant 4 : index
    %c0_15 = arith.constant 0 : index
    %26 = vector.load %arg3[%c4, %c0_15] : memref<8x128xf32, #tpu.memory_space<vmem>>, vector<1x128xf32>
    %cst_16 = arith.constant dense<0.000000e+00> : vector<8x128xf32>
    %27 = tpu.matmul %24, %25, %cst_16 {dimension_numbers = #tpu.dot_dimension_numbers<[1], [0], [0], [1], [0, 0, 1, 1], [], []>} : vector<8x128xf32>, vector<128x128xf32>, vector<8x128xf32> -> vector<8x128xf32>
    %28 = vector.broadcast %26 : vector<1x128xf32> to vector<8x128xf32>
    %29 = arith.addf %27, %28 : vector<8x128xf32>
    %30 = math.tanh %29 : vector<8x128xf32>
    %31 = math.tanh %30 : vector<8x128xf32>
    %cst_17 = arith.constant 2.000000e-01 : f32
    %32 = vector.broadcast %cst_17 : f32 to vector<8x128xf32>
    %33 = arith.mulf %31, %32 : vector<8x128xf32>
    %c0_18 = arith.constant 0 : index
    %c0_19 = arith.constant 0 : index
    %34 = vector.load %arg4[%c0_18, %c0_19] : memref<8x128xf32, #tpu.memory_space<vmem>>, vector<8x128xf32>
    tpu.vector_store %arg4[%c0_18, %c0_19], %33 {strides = array<i32>} : memref<8x128xf32, #tpu.memory_space<vmem>>, vector<8x128xf32>,
    return
  }
  func.func @transform_0(%arg0: i32) -> (i32, i32) {
    %c0_i32 = arith.constant 0 : i32
    %c0_i32_0 = arith.constant 0 : i32
    return %arg0, %c0_i32 : i32, i32
  }
  func.func @transform_1(%arg0: i32) -> (i32, i32) {
    %c0_i32 = arith.constant 0 : i32
    %c0_i32_0 = arith.constant 0 : i32
    %c0_i32_1 = arith.constant 0 : i32
    return %c0_i32, %c0_i32_0 : i32, i32
  }
  func.func @transform_2(%arg0: i32) -> (i32, i32) {
    %c0_i32 = arith.constant 0 : i32
    %c0_i32_0 = arith.constant 0 : i32
    %c0_i32_1 = arith.constant 0 : i32
    return %c0_i32, %c0_i32_0 : i32, i32
  }
  func.func @transform_3(%arg0: i32) -> (i32, i32) {
    %c0_i32 = arith.constant 0 : i32
    %c0_i32_0 = arith.constant 0 : i32
    return %arg0, %c0_i32 : i32, i32
  }
}

</mosaic_0001>

<bundles_post_ra>
// kernel: policy_network_forward.1
= control target key start
LH: loop header
LB: loop body
LE: loop exit
PB: predicated region body
PF: predicated region fallthrough
CT: control target
= control target key end

     0   :  { %v882_v0 = vmov 0.0|0.0   ;;  %vm883_vm0 = vmmov 0   ;;  %v884_v4 = vmov 0.0   ;;  %s1216_s1 = inlined_call_operand.vmem [shape: f32[640,128], index: 1, kind: input, shape index: {}]   ;;  %s1217_s0 = inlined_call_operand.vmem [shape: f32[8,128], index: 0, kind: input, shape index: {}]   ;;  %s1218_s2 = inlined_call_operand.vmem [shape: f32[8,128], index: 2, kind: input, shape index: {}]   ;;  %s1219_s3 = inlined_call_operand.vmem [shape: f32[8,128], index: 3, kind: output, shape index: {}]  }
   0x1   :  { %747 = vmatprep.subr.bf16.mxu0 %v882_v0  ;;  %v15_v1 = vld [vmem:[%s1216_s1] sm:$0xff]  ;;  %v16_v2 = vld [vmem:[%s1216_s1 + $0x8] sm:$0xff]  ;;  %v17_v3 = vld [vmem:[%s1216_s1 + $0x10] sm:$0xff]  ;;  %604 = vmatprep.mubr.msk.f32.mxu0 %vm883_vm0, %v884_v4 }
   0x2   :  { %v748_v5 = vpack.c.bf16 %v16_v2, %v15_v1  ;;  %v18_v6 = vld [vmem:[%s1216_s1 + $0x18] sm:$0xff]  ;;  %771 = vmatprep.subr.bf16.mxu1 %v882_v0  ;;  %639 = vmatprep.mubr.msk.f32.mxu1 %vm883_vm0, %v884_v4  ;;  %v19_v8 = vld [vmem:[%s1216_s1 + $0x20] sm:$0xff]  ;;  %v20_v9 = vld [vmem:[%s1216_s1 + $0x28] sm:$0xff] }
   0x3   :  { %v751_v7 = vpack.c.bf16 %v18_v6, %v17_v3  ;;  %v107_v10 = vld [vmem:[%s1216_s1 + $0x80] sm:$0xff]  ;;  %v108_v11 = vld [vmem:[%s1216_s1 + $0x88] sm:$0xff]  ;;  %v109_v12 = vld [vmem:[%s1216_s1 + $0x90] sm:$0xff]  ;;  %v754_v14 = vpack.c.bf16 %v20_v9, %v19_v8 }
   0x4   :  { %749 = vmatpush3.bf16.msra.mxu0 %v748_v5  ;;  %v110_v13 = vld [vmem:[%s1216_s1 + $0x98] sm:$0xff]  ;;  %v772_v15 = vpack.c.bf16 %v108_v11, %v107_v10  ;;  %v21_v16 = vld [vmem:[%s1216_s1 + $0x30] sm:$0xff]  ;;  %v111_v19 = vld [vmem:[%s1216_s1 + $0xa0] sm:$0xff] }
   0x5   :  { %750 = vmatprep.subr.bf16.mxu0 %v882_v0  ;;  %v22_v17 = vld [vmem:[%s1216_s1 + $0x38] sm:$0xff]  ;;  %v775_v18 = vpack.c.bf16 %v110_v13, %v109_v12  ;;  %v112_v20 = vld [vmem:[%s1216_s1 + $0xa8] sm:$0xff]  ;;  %v23_v22 = vld [vmem:[%s1216_s1 + $0x40] sm:$0xff] }
   0x6   :  { %773 = vmatpush3.bf16.msra.mxu1 %v772_v15  ;;  %v757_v21 = vpack.c.bf16 %v22_v17, %v21_v16  ;;  %v24_v23 = vld [vmem:[%s1216_s1 + $0x48] sm:$0xff]  ;;  %v778_v24 = vpack.c.bf16 %v112_v20, %v111_v19  ;;  %v113_v25 = vld [vmem:[%s1216_s1 + $0xb0] sm:$0xff]  ;;  %v114_v26 = vld [vmem:[%s1216_s1 + $0xb8] sm:$0xff] }
   0x7   :  { %774 = vmatprep.subr.bf16.mxu1 %v882_v0  ;;  %v760_v27 = vpack.c.bf16 %v24_v23, %v23_v22  ;;  %v25_v28 = vld [vmem:[%s1216_s1 + $0x50] sm:$0xff]  ;;  %v26_v29 = vld [vmem:[%s1216_s1 + $0x58] sm:$0xff]  ;;  %v781_v30 = vpack.c.bf16 %v114_v26, %v113_v25  ;;  %v115_v31 = vld [vmem:[%s1216_s1 + $0xc0] sm:$0xff] }
   0x8   :  { %752 = vmatpush3.bf16.msra.mxu0 %v751_v7  ;;  %v116_v32 = vld [vmem:[%s1216_s1 + $0xc8] sm:$0xff]  ;;  %v763_v33 = vpack.c.bf16 %v26_v29, %v25_v28  ;;  %v27_v34 = vld [vmem:[%s1216_s1 + $0x60] sm:$0xff]  ;;  %v29_v38 = vld [vmem:[%s1216_s1 + $0x70] sm:$0xff] }
   0x9   :  { %753 = vmatprep.subr.bf16.mxu0 %v882_v0  ;;  %v28_v35 = vld [vmem:[%s1216_s1 + $0x68] sm:$0xff]  ;;  %v784_v36 = vpack.c.bf16 %v116_v32, %v115_v31  ;;  %v30_v39 = vld [vmem:[%s1216_s1 + $0x78] sm:$0xff]  ;;  %v14_v41 = vld [vmem:[%s1217_s0] sm:$0xff] }
   0xa   :  { %776 = vmatpush3.bf16.msra.mxu1 %v775_v18  ;;  %v766_v37 = vpack.c.bf16 %v28_v35, %v27_v34  ;;  %v769_v40 = vpack.c.bf16 %v30_v39, %v29_v38  ;;  %v117_v42 = vld [vmem:[%s1216_s1 + $0xd0] sm:$0xff]  ;;  %v118_v43 = vld [vmem:[%s1216_s1 + $0xd8] sm:$0xff]  ;;  %v119_v45 = vld [vmem:[%s1216_s1 + $0xe0] sm:$0xff] }
   0xb   :  { %777 = vmatprep.subr.bf16.mxu1 %v882_v0  ;;  %v787_v44 = vpack.c.bf16 %v118_v43, %v117_v42  ;;  %v120_v46 = vld [vmem:[%s1216_s1 + $0xe8] sm:$0xff]  ;;  %v121_v48 = vld [vmem:[%s1216_s1 + $0xf0] sm:$0xff]  ;;  %v122_v49 = vld [vmem:[%s1216_s1 + $0xf8] sm:$0xff] }
   0xc   :  { %755 = vmatpush3.bf16.msra.mxu0 %v754_v14  ;;  %v790_v47 = vpack.c.bf16 %v120_v46, %v119_v45  ;;  %v793_v50 = vpack.c.bf16 %v122_v49, %v121_v48  ;;  %v199_v51 = vld [vmem:[%s1216_s1 + $0x100] sm:$0xff]  ;;  %v200_v52 = vld [vmem:[%s1216_s1 + $0x108] sm:$0xff]  ;;  %v201_v53 = vld [vmem:[%s1216_s1 + $0x110] sm:$0xff] }
   0xd   :  { %756 = vmatprep.subr.bf16.mxu0 %v882_v0  ;;  %v796_v54 = vpack.c.bf16 %v200_v52, %v199_v51  ;;  %v202_v55 = vld [vmem:[%s1216_s1 + $0x118] sm:$0xff]  ;;  %v203_v57 = vld [vmem:[%s1216_s1 + $0x120] sm:$0xff]  ;;  %v204_v58 = vld [vmem:[%s1216_s1 + $0x128] sm:$0xff] }
   0xe   :  { %779 = vmatpush3.bf16.msra.mxu1 %v778_v24  ;;  %v799_v56 = vpack.c.bf16 %v202_v55, %v201_v53  ;;  %v802_v59 = vpack.c.bf16 %v204_v58, %v203_v57  ;;  %v205_v60 = vld [vmem:[%s1216_s1 + $0x130] sm:$0xff]  ;;  %v206_v61 = vld [vmem:[%s1216_s1 + $0x138] sm:$0xff]  ;;  %v207_v63 = vld [vmem:[%s1216_s1 + $0x140] sm:$0xff] }
   0xf   :  { %780 = vmatprep.subr.bf16.mxu1 %v882_v0  ;;  %v805_v62 = vpack.c.bf16 %v206_v61, %v205_v60  ;;  %v208_v1 = vld [vmem:[%s1216_s1 + $0x148] sm:$0xff]  ;;  %v482_v3 = vld [vmem:[%s1218_s2] ss:$0 sm:$0xff]  ;;  %v209_v9 = vld [vmem:[%s1216_s1 + $0x150] sm:$0xff] }
  0x10   :  { %758 = vmatpush3.bf16.msra.mxu0 %v757_v21  ;;  %v808_v2 = vpack.c.bf16 %v208_v1, %v207_v63  ;;  %v210_v10 = vld [vmem:[%s1216_s1 + $0x158] sm:$0xff]  ;;  %v211_v12 = vld [vmem:[%s1216_s1 + $0x160] sm:$0xff]  ;;  %v212_v13 = vld [vmem:[%s1216_s1 + $0x168] sm:$0xff] }
  0x11   :  { %759 = vmatprep.subr.bf16.mxu0 %v882_v0  ;;  %v811_v11 = vpack.c.bf16 %v210_v10, %v209_v9  ;;  %v814_v14 = vpack.c.bf16 %v212_v13, %v211_v12  ;;  %v213_v15 = vld [vmem:[%s1216_s1 + $0x170] sm:$0xff]  ;;  %v214_v16 = vld [vmem:[%s1216_s1 + $0x178] sm:$0xff]  ;;  %v291_v18 = vld [vmem:[%s1216_s1 + $0x180] sm:$0xff] }
  0x12   :  { %782 = vmatpush3.bf16.msra.mxu1 %v781_v30  ;;  %v817_v17 = vpack.c.bf16 %v214_v16, %v213_v15  ;;  %v292_v19 = vld [vmem:[%s1216_s1 + $0x188] sm:$0xff]  ;;  %v293_v20 = vld [vmem:[%s1216_s1 + $0x190] sm:$0xff]  ;;  %v294_v22 = vld [vmem:[%s1216_s1 + $0x198] sm:$0xff] }
  0x13   :  { %783 = vmatprep.subr.bf16.mxu1 %v882_v0  ;;  %v820_v21 = vpack.c.bf16 %v292_v19, %v291_v18  ;;  %v823_v23 = vpack.c.bf16 %v294_v22, %v293_v20  ;;  %v295_v24 = vld [vmem:[%s1216_s1 + $0x1a0] sm:$0xff]  ;;  %v296_v25 = vld [vmem:[%s1216_s1 + $0x1a8] sm:$0xff]  ;;  %v298_v28 = vld [vmem:[%s1216_s1 + $0x1b8] sm:$0xff] }
  0x14   :  { %761 = vmatpush3.bf16.msra.mxu0 %v760_v27  ;;  %v826_v26 = vpack.c.bf16 %v296_v25, %v295_v24  ;;  %v297_v27 = vld [vmem:[%s1216_s1 + $0x1b0] sm:$0xff]  ;;  %v299_v30 = vld [vmem:[%s1216_s1 + $0x1c0] sm:$0xff]  ;;  %v300_v31 = vld [vmem:[%s1216_s1 + $0x1c8] sm:$0xff] }
  0x15   :  { %762 = vmatprep.subr.bf16.mxu0 %v882_v0  ;;  %v829_v29 = vpack.c.bf16 %v298_v28, %v297_v27  ;;  %v832_v32 = vpack.c.bf16 %v300_v31, %v299_v30  ;;  %v301_v38 = vld [vmem:[%s1216_s1 + $0x1d0] sm:$0xff]  ;;  %v302_v39 = vld [vmem:[%s1216_s1 + $0x1d8] sm:$0xff]  ;;  %v304_v42 = vld [vmem:[%s1216_s1 + $0x1e8] sm:$0xff] }
  0x16   :  { %785 = vmatpush3.bf16.msra.mxu1 %v784_v36  ;;  %v305_v43 = vld [vmem:[%s1216_s1 + $0x1f0] sm:$0xff]  ;;  %v383_v46 = vld [vmem:[%s1216_s1 + $0x200] sm:$0xff]  ;;  %v388_v53 = vld [vmem:[%s1216_s1 + $0x228] sm:$0xff] }
  0x17   :  { %786 = vmatprep.subr.bf16.mxu1 %v882_v0  ;;  %v385_v48 = vld [vmem:[%s1216_s1 + $0x210] sm:$0xff]  ;;  %v387_v52 = vld [vmem:[%s1216_s1 + $0x220] sm:$0xff] }
  0x18   :  { %764 = vmatpush3.bf16.msra.mxu0 %v763_v33  ;;  %v483_v33 = vld [vmem:[%s1218_s2 + $0x1] ss:$0 sm:$0xff]  ;;  %v389_v55 = vld [vmem:[%s1216_s1 + $0x230] sm:$0xff]  ;;  %v484_v61 = vld [vmem:[%s1218_s2 + $0x2] ss:$0 sm:$0xff] }
  0x19   :  { %765 = vmatprep.subr.bf16.mxu0 %v882_v0  ;;  %v391_v58 = vld [vmem:[%s1216_s1 + $0x240] sm:$0xff]  ;;  %v397_v10 = vld [vmem:[%s1216_s1 + $0x270] sm:$0xff] }
  0x1a   :  { %788 = vmatpush3.bf16.msra.mxu1 %v787_v44  ;;  %v306_v44 = vld [vmem:[%s1216_s1 + $0x1f8] sm:$0xff]  ;;  %v485_v13 = vld [vmem:[%s1218_s2 + $0x3] ss:$0 sm:$0xff]  ;;  %v486_v18 = vld [vmem:[%s1218_s2 + $0x4] ss:$0 sm:$0xff] }
  0x1b   :  { %789 = vmatprep.subr.bf16.mxu1 %v882_v0  ;;  %v841_v45 = vpack.c.bf16 %v306_v44, %v305_v43 }
  0x1c   :  { %767 = vmatpush3.bf16.msra.mxu0 %v766_v37 }
  0x1d   :  { %768 = vmatprep.subr.bf16.mxu0 %v882_v0 }
  0x1e   :  { %791 = vmatpush3.bf16.msra.mxu1 %v790_v47  ;;  %v384_v47 = vld [vmem:[%s1216_s1 + $0x208] sm:$0xff] }
  0x1f   :  { %792 = vmatprep.subr.bf16.mxu1 %v882_v0  ;;  %v844_v49 = vpack.c.bf16 %v384_v47, %v383_v46 }
  0x20   :  { %770 = vmatpush3.bf16.msra.mxu0 %v769_v40  ;;  %v835_v40 = vpack.c.bf16 %v302_v39, %v301_v38 }
  0x21   :  { %795 = vmatprep.subr.bf16.mxu0 %v882_v0 }
  0x22   :  { %794 = vmatpush3.bf16.msra.mxu1 %v793_v50  ;;  %v386_v50 = vld [vmem:[%s1216_s1 + $0x218] sm:$0xff] }
  0x23   :  { %605 = vmatmul.mubr.f32.vlgmr.msra.gmra.mrb[0].mxu0 %v14_v41  ;;  %819 = vmatprep.subr.bf16.mxu1 %v882_v0  ;;  %v303_v41 = vld [vmem:[%s1216_s1 + $0x1e0] sm:$0xff]  ;;  %v847_v51 = vpack.c.bf16 %v386_v50, %v385_v48 }
  0x24   :  { %674 = vmatprep.mubr.msk.f32.mxu0 %vm883_vm0, %v884_v4  ;;  %797 = vmatpush3.bf16.msra.mxu0 %v796_v54  ;;  %v850_v54 = vpack.c.bf16 %v388_v53, %v387_v52 }
  0x25   :  { %798 = vmatprep.subr.bf16.mxu0 %v882_v0 }
  0x28   :  { %800 = vmatpush3.bf16.msra.mxu0 %v799_v56  ;;  %v390_v56 = vld [vmem:[%s1216_s1 + $0x238] sm:$0xff] }
  0x29   :  { %801 = vmatprep.subr.bf16.mxu0 %v882_v0  ;;  %v853_v57 = vpack.c.bf16 %v390_v56, %v389_v55 }
  0x2c   :  { %803 = vmatpush3.bf16.msra.mxu0 %v802_v59  ;;  %v392_v59 = vld [vmem:[%s1216_s1 + $0x248] sm:$0xff] }
  0x2d   :  { %804 = vmatprep.subr.bf16.mxu0 %v882_v0  ;;  %v856_v60 = vpack.c.bf16 %v392_v59, %v391_v58 }
  0x30   :  { %806 = vmatpush3.bf16.msra.mxu0 %v805_v62 }
  0x31   :  { %807 = vmatprep.subr.bf16.mxu0 %v882_v0 }
  0x34   :  { %809 = vmatpush3.bf16.msra.mxu0 %v808_v2 }
  0x35   :  { %810 = vmatprep.subr.bf16.mxu0 %v882_v0 }
  0x38   :  { %812 = vmatpush3.bf16.msra.mxu0 %v811_v11  ;;  %v398_v11 = vld [vmem:[%s1216_s1 + $0x278] sm:$0xff] }
  0x39   :  { %813 = vmatprep.subr.bf16.mxu0 %v882_v0  ;;  %v865_v12 = vpack.c.bf16 %v398_v11, %v397_v10 }
  0x3c   :  { %815 = vmatpush3.bf16.msra.mxu0 %v814_v14 }
  0x3d   :  { %816 = vmatprep.subr.bf16.mxu0 %v882_v0 }
  0x40   :  { %818 = vmatpush3.bf16.msra.mxu0 %v817_v17 }
  0x41   :  { %843 = vmatprep.subr.bf16.mxu0 %v882_v0 }
  0xf6   :  { %v102_v5 = vpop.f32.mrb[0].mxu0 }
  0xf7   :  { %v103_v6 = vadd.f32 %v482_v3, %v102_v5  ;;  %v606_v7 = vpop.f32.mrb[1].mxu0  ;;  %v393_v3 = vld [vmem:[%s1216_s1 + $0x250] sm:$0xff]  ;;  %v394_v5 = vld [vmem:[%s1216_s1 + $0x258] sm:$0xff] }
  0xf8   :  { %v395_v7 = vld [vmem:[%s1216_s1 + $0x260] sm:$0xff] }
  0xf9   :  { %870 = vtanh.f32 %v103_v6  ;;  %v859_v6 = vpack.c.bf16 %v394_v5, %v393_v3 }
 0x103   :  { %v871_v8 = vpop.eup %870 }
 0x104   :  { %640 = vmatmul.mubr.f32.vlgmr.msra.gmra.mrb[0].mxu1 %v871_v8  ;;  %v396_v8 = vld [vmem:[%s1216_s1 + $0x268] sm:$0xff] }
 0x105   :  { %709 = vmatprep.mubr.msk.f32.mxu1 %vm883_vm0, %v884_v4  ;;  %821 = vmatpush3.bf16.msra.mxu1 %v820_v21  ;;  %v862_v9 = vpack.c.bf16 %v396_v8, %v395_v7 }
 0x106   :  { %822 = vmatprep.subr.bf16.mxu1 %v882_v0 }
 0x109   :  { %824 = vmatpush3.bf16.msra.mxu1 %v823_v23 }
 0x10a   :  { %825 = vmatprep.subr.bf16.mxu1 %v882_v0 }
 0x10d   :  { %827 = vmatpush3.bf16.msra.mxu1 %v826_v26 }
 0x10e   :  { %828 = vmatprep.subr.bf16.mxu1 %v882_v0 }
 0x111   :  { %830 = vmatpush3.bf16.msra.mxu1 %v829_v29 }
 0x112   :  { %831 = vmatprep.subr.bf16.mxu1 %v882_v0 }
 0x115   :  { %833 = vmatpush3.bf16.msra.mxu1 %v832_v32 }
 0x116   :  { %834 = vmatprep.subr.bf16.mxu1 %v882_v0 }
 0x119   :  { %836 = vmatpush3.bf16.msra.mxu1 %v835_v40 }
 0x11a   :  { %837 = vmatprep.subr.bf16.mxu1 %v882_v0 }
 0x1d7   :  { %v194_v34 = vpop.f32.mrb[0].mxu1 }
 0x1d8   :  { %v195_v35 = vadd.f32 %v483_v33, %v194_v34  ;;  %v641_v36 = vpop.f32.mrb[1].mxu1 }
 0x1da   :  { %872 = vtanh.f32 %v195_v35 }
 0x1e4   :  { %v873_v37 = vpop.eup %872 }
 0x1e5   :  { %675 = vmatmul.mubr.f32.vlgmr.msra.gmra.mrb[2].mxu0 %v873_v37 }
 0x1e6   :  { %744 = vmatprep.mubr.msk.f32.mxu0 %vm883_vm0, %v884_v4  ;;  %v838_v4 = vpack.c.bf16 %v304_v42, %v303_v41  ;;  %845 = vmatpush3.bf16.msra.mxu0 %v844_v49 }
 0x1e7   :  { %846 = vmatprep.subr.bf16.mxu0 %v882_v0 }
 0x1e8   :  { %839 = vmatpush3.bf16.msra.mxu1 %v838_v4 }
 0x1e9   :  { %840 = vmatprep.subr.bf16.mxu1 %v882_v0 }
 0x1ea   :  { %848 = vmatpush3.bf16.msra.mxu0 %v847_v51 }
 0x1eb   :  { %849 = vmatprep.subr.bf16.mxu0 %v882_v0 }
 0x1ec   :  { %842 = vmatpush3.bf16.msra.mxu1 %v841_v45 }
 0x1ee   :  { %851 = vmatpush3.bf16.msra.mxu0 %v850_v54 }
 0x1ef   :  { %852 = vmatprep.subr.bf16.mxu0 %v882_v0 }
 0x1f2   :  { %854 = vmatpush3.bf16.msra.mxu0 %v853_v57 }
 0x1f3   :  { %855 = vmatprep.subr.bf16.mxu0 %v882_v0 }
 0x1f6   :  { %857 = vmatpush3.bf16.msra.mxu0 %v856_v60 }
 0x1f7   :  { %858 = vmatprep.subr.bf16.mxu0 %v882_v0 }
 0x1fa   :  { %860 = vmatpush3.bf16.msra.mxu0 %v859_v6 }
 0x1fb   :  { %861 = vmatprep.subr.bf16.mxu0 %v882_v0 }
 0x1fe   :  { %863 = vmatpush3.bf16.msra.mxu0 %v862_v9 }
 0x1ff   :  { %864 = vmatprep.subr.bf16.mxu0 %v882_v0 }
 0x202   :  { %866 = vmatpush3.bf16.msra.mxu0 %v865_v12 }
 0x2b8   :  { %v286_v62 = vpop.f32.mrb[2].mxu0 }
 0x2b9   :  { %v287_v63 = vadd.f32 %v484_v61, %v286_v62  ;;  %v676_v1 = vpop.f32.mrb[3].mxu0 }
 0x2bb   :  { %874 = vtanh.f32 %v287_v63 }
 0x2c5   :  { %v875_v2 = vpop.eup %874 }
 0x2c6   :  { %710 = vmatmul.mubr.f32.vlgmr.msra.gmra.mrb[2].mxu1 %v875_v2 }
 0x399   :  { %v378_v14 = vpop.f32.mrb[2].mxu1 }
 0x39a   :  { %v379_v15 = vadd.f32 %v485_v13, %v378_v14  ;;  %v711_v16 = vpop.f32.mrb[3].mxu1 }
 0x39c   :  { %876 = vtanh.f32 %v379_v15 }
 0x3a6   :  { %v877_v17 = vpop.eup %876 }
 0x3a7   :  { %745 = vmatmul.mubr.f32.vlgmr.msra.gmra.mrb[4].mxu0 %v877_v17 }
 0x47a   :  { %v470_v19 = vpop.f32.mrb[4].mxu0 }
 0x47b   :  { %v471_v20 = vadd.f32 %v486_v18, %v470_v19  ;;  %v746_v21 = vpop.f32.mrb[5].mxu0 }
 0x47d   :  { %878 = vtanh.f32 %v471_v20 }
 0x487   :  { %v879_v0 = vpop.eup %878 }
 0x488   :  { %880 = vtanh.f32 %v879_v0 }
 0x492   :  { %v881_v22 = vpop.eup %880 }
 0x493   :  { %v476_v23 = vmul.f32 0.2, %v881_v22 }
 0x495   :  { %477 = vst [vmem:[%s1219_s3] sm:$0xff] %v476_v23 }

</bundles_post_ra>
